<compile_context>
chip_gen: v7x
topology: tpu7x:2x2x1
jax: 0.10.0
libtpu: 0.0.40
codegen_flags: <defaults>
</compile_context>

<pallas_src>
import jax
import jax.numpy as jnp
from jax.experimental import pallas as pl
from jax.experimental.pallas import tpu as pltpu


def _round_up(v, m):
    return (v + m - 1) // m * m


# ---------------------------------------------------------------------------
# Part 1: FirstStageEncoderBlock conv front-end (3x3, stride 2, pad 1 + LeakyReLU)
# ---------------------------------------------------------------------------
def _conv_mm_kernel(p_ref, w_ref, b_ref, o_ref):
    """Fused im2col-matmul + bias + LeakyReLU(0.2) for one row tile."""
    y = jnp.dot(p_ref[...], w_ref[...], preferred_element_type=jnp.float32)
    y = y + b_ref[...]
    o_ref[...] = jnp.where(y > 0, y, 0.2 * y).astype(o_ref.dtype)


def first_stage_encoder_conv(x, w, b):
    """x: (B, T, Cin, H, W), w: (Cout*T, Cin*T, 3, 3), b: (Cout*T,).
    Returns (B, T, Cout, H//2, W//2) — the conv+LeakyReLU half of the block."""
    B, T, Cin, H, W = x.shape
    CinT = Cin * T
    CoutT = w.shape[0]
    Ho, Wo = (H + 1) // 2, (W + 1) // 2

    # (B,T,Cin,H,W) -> (B, Cin*T, H, W) -> NHWC, zero-pad spatially by 1.
    xn = jnp.transpose(x.reshape(B, CinT, H, W), (0, 2, 3, 1)).astype(jnp.float32)
    xp = jnp.pad(xn, ((0, 0), (1, 1), (1, 1), (0, 0)))

    # im2col for the 9 stride-2 taps (layout glue; the matmul runs in Pallas).
    taps = [xp[:, dy:dy + 2 * Ho:2, dx:dx + 2 * Wo:2, :]
            for dy in range(3) for dx in range(3)]
    patches = jnp.concatenate(taps, axis=-1).reshape(B * Ho * Wo, 9 * CinT)

    # (Cout*T, Cin*T, ky, kx) -> (ky, kx, cin, cout) -> (9*Cin*T, Cout*T)
    wmat = jnp.transpose(w, (2, 3, 1, 0)).reshape(9 * CinT, CoutT)

    # Lane-dense output columns; pad rows up to the tile size.
    Np = _round_up(CoutT, 128)
    M = B * Ho * Wo
    tm = 256 if M >= 256 else _round_up(M, 8)
    Mp = _round_up(M, tm)
    K = 9 * CinT
    patches = jnp.pad(patches, ((0, Mp - M), (0, 0))).astype(jnp.bfloat16)
    wmat = jnp.pad(wmat, ((0, 0), (0, Np - CoutT))).astype(jnp.bfloat16)
    bias = jnp.pad(b, (0, Np - CoutT)).reshape(1, Np).astype(jnp.float32)

    out = pl.pallas_call(
        _conv_mm_kernel,
        out_shape=jax.ShapeDtypeStruct((Mp, Np), jnp.float32),
        grid_spec=pltpu.PrefetchScalarGridSpec(
            num_scalar_prefetch=0,
            grid=(Mp // tm,),
            in_specs=[
                pl.BlockSpec((tm, K), lambda i: (i, 0)),      # im2col rows
                pl.BlockSpec((K, Np), lambda i: (0, 0)),      # weight (resident)
                pl.BlockSpec((1, Np), lambda i: (0, 0)),      # bias  (resident)
            ],
            out_specs=pl.BlockSpec((tm, Np), lambda i: (i, 0)),
        ),
        compiler_params=pltpu.CompilerParams(
            dimension_semantics=("parallel",)),
    )(patches, wmat, bias)

    y = out[:M, :CoutT].reshape(B, Ho, Wo, CoutT)
    y = jnp.transpose(y, (0, 3, 1, 2))                        # (B, Cout*T, Ho, Wo)
    return y.reshape(B, T, CoutT // T, Ho, Wo)


def first_stage_encoder_conv_ref(x, w, b):
    """Plain-JAX reference for the conv front-end."""
    B, T, Cin, H, W = x.shape
    x2 = x.reshape(B, T * Cin, H, W)
    y = jax.lax.conv_general_dilated(
        x2, w, window_strides=(2, 2), padding=((1, 1), (1, 1)),
        dimension_numbers=('NCHW', 'OIHW', 'NCHW'))
    y = y + b[None, :, None, None]
    y = jnp.where(y > 0, y, 0.2 * y)
    return y.reshape(B, T, -1, H // 2, W // 2)


# ---------------------------------------------------------------------------
# Part 2: SelfAttention helper (SAGAN-style) — flash-tiled fused kernel
#   scores = (x@A) @ x^T + r2 ; attn = softmax(scores) ; y = gamma*(attn V) + x
#   with A = Wq^T Wk, r2_j = x_j . (Wk^T bq), V = x Wv^T + bv (all in wrapper).
# ---------------------------------------------------------------------------
def _attn_flash_kernel(xq_ref, xa_ref, xk_ref, v_ref, r2_ref, gamma_ref,
                       o_ref, m_sc, l_sc, acc_sc):
    """One (batch, query-tile, key-tile) step with online softmax."""
    ki = pl.program_id(2)

    @pl.when(ki == 0)
    def _init():
        m_sc[...] = jnp.full(m_sc.shape, -jnp.inf, dtype=m_sc.dtype)
        l_sc[...] = jnp.zeros(l_sc.shape, dtype=l_sc.dtype)
        acc_sc[...] = jnp.zeros(acc_sc.shape, dtype=acc_sc.dtype)

    # Scores contract over the full channel depth C (NT matmul, no transpose).
    s = jax.lax.dot_general(
        xa_ref[...], xk_ref[...],
        dimension_numbers=(((1,), (1,)), ((), ())),
        preferred_element_type=jnp.float32)                   # (tq, tk)
    s = s + r2_ref[...]                                       # key bias / -1e30 pad mask

    # Online softmax; elementwise math kept in f32 (v5e-safe; on v6e/v7x a
    # bf16 exp would further unload the EUP but is not applied here).
    m_prev = m_sc[...]
    m_new = jnp.maximum(m_prev, jnp.max(s, axis=-1, keepdims=True))
    alpha = jnp.exp(m_prev - m_new)
    p = jnp.exp(s - m_new)                                    # (tq, tk)
    l_sc[...] = alpha * l_sc[...] + jnp.sum(p, axis=-1, keepdims=True)
    acc_sc[...] = alpha * acc_sc[...] + jnp.dot(
        p.astype(jnp.bfloat16), v_ref[...], preferred_element_type=jnp.float32)
    m_sc[...] = m_new

    @pl.when(ki == pl.num_programs(2) - 1)
    def _finalize():
        out = acc_sc[...] * pl.reciprocal(l_sc[...], approx=True)
        o_ref[...] = (gamma_ref[0, 0] * out + xq_ref[...]).astype(o_ref.dtype)


def _attn_single_kernel(xq_ref, xa_ref, xk_ref, v_ref, r2_ref, gamma_ref, o_ref):
    """Small-N fast path: all keys in one pass, no flash machinery."""
    s = jax.lax.dot_general(
        xa_ref[...], xk_ref[...],
        dimension_numbers=(((1,), (1,)), ((), ())),
        preferred_element_type=jnp.float32)                   # (tq, N)
    s = s + r2_ref[...]
    m = jnp.max(s, axis=-1, keepdims=True)
    p = jnp.exp(s - m)
    l = jnp.sum(p, axis=-1, keepdims=True)
    out = jnp.dot(p.astype(jnp.bfloat16), v_ref[...],
                  preferred_element_type=jnp.float32)         # (tq, C)
    out = out * pl.reciprocal(l, approx=True)
    o_ref[...] = (gamma_ref[0, 0] * out + xq_ref[...]).astype(o_ref.dtype)


def self_attention(x_nchw, wq, bq, wk, bk, wv, bv, gamma):
    """x_nchw: (B, C, H, W) f32.  Conv1x1 weights wq/wk: (C//8, C), wv: (C, C)."""
    B, C, H, W = x_nchw.shape
    N = H * W
    del bk  # row-constant under the key-axis softmax -> cancels exactly.

    # ---- layout glue + lane-dense channel padding (C -> >= 128, mult of 128) ----
    C_pad = _round_up(max(C, 128), 128)
    x_flat = jnp.transpose(x_nchw, (0, 2, 3, 1)).reshape(B, N, C).astype(jnp.float32)
    if C_pad != C:
        x_flat = jnp.pad(x_flat, ((0, 0), (0, 0), (0, C_pad - C)))
        wq = jnp.pad(wq, ((0, 0), (0, C_pad - C)))
        wk = jnp.pad(wk, ((0, 0), (0, C_pad - C)))
        wv = jnp.pad(wv, ((0, C_pad - C), (0, C_pad - C)))
        bv = jnp.pad(bv, (0, C_pad - C))

    # ---- token padding (N -> multiple of 128); padded keys masked below ----
    N_pad = _round_up(N, 128)
    if N_pad != N:
        x_flat = jnp.pad(x_flat, ((0, 0), (0, N_pad - N), (0, 0)))

    # ---- all projections hoisted out of the kernel (perf review) ----
    A = wq.T @ wk                                             # (C_pad, C_pad)
    xa = jnp.einsum('bnc,cd->bnd', x_flat, A).astype(jnp.bfloat16)
    kb = wk.T @ bq                                            # (C_pad,)
    r2 = jnp.einsum('bnc,c->bn', x_flat, kb)
    key_mask = jnp.arange(N_pad)[None, :] < N                 # mask padded keys
    r2 = jnp.where(key_mask, r2, -1e30).astype(jnp.float32).reshape(B, 1, N_pad)
    v = (jnp.einsum('bnc,oc->bno', x_flat, wv)
         + bv[None, None, :]).astype(jnp.bfloat16)            # V = x Wv^T + bv
    xk_b = x_flat.astype(jnp.bfloat16)                        # bf16 key stream
    gamma2 = gamma.reshape(1, 1).astype(jnp.float32)

    # ---- tile selection: big tiles, small-N single-pass fast path ----
    if N_pad <= 512:
        tk = N_pad                                            # single key pass
    elif N_pad % 256 == 0:
        tk = 256
    else:
        tk = 128
    tq = 256 if (N_pad % 256 == 0 and N_pad >= 256) else 128
    nq, nk = N_pad // tq, N_pad // tk

    if nk == 1:
        out_flat = pl.pallas_call(
            _attn_single_kernel,
            out_shape=jax.ShapeDtypeStruct((B, N_pad, C_pad), jnp.float32),
            grid_spec=pltpu.PrefetchScalarGridSpec(
                num_scalar_prefetch=0,
                grid=(B, nq),
                in_specs=[
                    pl.BlockSpec((None, tq, C_pad), lambda b, qi: (b, qi, 0)),    # x (f32 residual)
                    pl.BlockSpec((None, tq, C_pad), lambda b, qi: (b, qi, 0)),    # x@A (bf16)
                    pl.BlockSpec((None, N_pad, C_pad), lambda b, qi: (b, 0, 0)),  # keys (bf16)
                    pl.BlockSpec((None, N_pad, C_pad), lambda b, qi: (b, 0, 0)),  # V (bf16)
                    pl.BlockSpec((None, 1, N_pad), lambda b, qi: (b, 0, 0)),      # r2 key bias
                    pl.BlockSpec((1, 1), lambda b, qi: (0, 0),
                                 memory_space=pltpu.SMEM),                        # gamma
                ],
                out_specs=pl.BlockSpec((None, tq, C_pad), lambda b, qi: (b, qi, 0)),
            ),
            compiler_params=pltpu.CompilerParams(
                dimension_semantics=("parallel", "parallel")),
        )(x_flat, xa, xk_b, v, r2, gamma2)
    else:
        out_flat = pl.pallas_call(
            _attn_flash_kernel,
            out_shape=jax.ShapeDtypeStruct((B, N_pad, C_pad), jnp.float32),
            grid_spec=pltpu.PrefetchScalarGridSpec(
                num_scalar_prefetch=0,
                grid=(B, nq, nk),
                in_specs=[
                    pl.BlockSpec((None, tq, C_pad), lambda b, qi, ki: (b, qi, 0)),
                    pl.BlockSpec((None, tq, C_pad), lambda b, qi, ki: (b, qi, 0)),
                    pl.BlockSpec((None, tk, C_pad), lambda b, qi, ki: (b, ki, 0)),
                    pl.BlockSpec((None, tk, C_pad), lambda b, qi, ki: (b, ki, 0)),
                    pl.BlockSpec((None, 1, tk), lambda b, qi, ki: (b, 0, ki)),
                    pl.BlockSpec((1, 1), lambda b, qi, ki: (0, 0),
                                 memory_space=pltpu.SMEM),
                ],
                out_specs=pl.BlockSpec((None, tq, C_pad), lambda b, qi, ki: (b, qi, 0)),
                scratch_shapes=[
                    pltpu.VMEM((tq, 1), jnp.float32),        # running max m
                    pltpu.VMEM((tq, 1), jnp.float32),        # running sum l
                    pltpu.VMEM((tq, C_pad), jnp.float32),    # output accumulator
                ],
            ),
            compiler_params=pltpu.CompilerParams(
                dimension_semantics=("parallel", "parallel", "arbitrary")),
        )(x_flat, xa, xk_b, v, r2, gamma2)

    out_flat = out_flat[:, :N, :C]                            # drop N / C padding
    return jnp.transpose(out_flat.reshape(B, H, W, C), (0, 3, 1, 2))


def self_attention_ref(x_nchw, wq, bq, wk, bk, wv, bv, gamma):
    """Plain-JAX f32 reference mirroring the PyTorch forward exactly."""
    B, C, H, W = x_nchw.shape
    N = H * W
    xf = x_nchw.reshape(B, C, N)
    q = jnp.einsum('oc,bcn->bon', wq, xf) + bq[None, :, None]
    k = jnp.einsum('oc,bcn->bon', wk, xf) + bk[None, :, None]
    v = jnp.einsum('oc,bcn->bon', wv, xf) + bv[None, :, None]
    attn = jax.nn.softmax(jnp.einsum('bci,bcj->bij', q, k), axis=-1)
    out = jnp.einsum('bcj,bij->bci', v, attn).reshape(B, C, H, W)
    return gamma.reshape(()) * out + x_nchw


if __name__ == "__main__":
    key = jax.random.PRNGKey(0)

    # ---- FirstStageEncoderBlock conv + LeakyReLU front-end ----
    B, T, Cin, Cout, H, W = 2, 4, 8, 32, 16, 16
    kx, kw, kb = jax.random.split(jax.random.fold_in(key, 0), 3)
    x = jax.random.normal(kx, (B, T, Cin, H, W), dtype=jnp.float32)
    w = 0.05 * jax.random.normal(kw, (Cout * T, Cin * T, 3, 3), dtype=jnp.float32)
    b = 0.05 * jax.random.normal(kb, (Cout * T,), dtype=jnp.float32)
    y = jax.block_until_ready(first_stage_encoder_conv(x, w, b))
    y_ref = first_stage_encoder_conv_ref(x, w, b)
    assert y.shape == (B, T, Cout, H // 2, W // 2)
    assert jnp.allclose(y, y_ref, atol=2e-2, rtol=2e-2), (
        float(jnp.max(jnp.abs(y - y_ref))))
    # TODO(synk): the TrajGRU recurrence (flow-warping grid_sample) that follows
    # the conv in FirstStageEncoderBlock is not translated to Pallas.

    # ---- SelfAttention helper: fast path / flash path / padded path ----
    configs = [(2, 128, 16, 16),   # N=256  -> single-pass fast path
               (2, 128, 32, 32),   # N=1024 -> flash path, tq=tk=256
               (2, 64, 24, 24)]    # N=576, C=64 -> N/C padding + flash path
    for idx, (Ba, Ca, Ha, Wa) in enumerate(configs):
        ks = jax.random.split(jax.random.fold_in(key, idx + 1), 7)
        C8 = Ca // 8
        s = 0.05
        xa_in = jax.random.normal(ks[0], (Ba, Ca, Ha, Wa), dtype=jnp.float32)
        wq = s * jax.random.normal(ks[1], (C8, Ca), dtype=jnp.float32)
        bq = s * jax.random.normal(ks[2], (C8,), dtype=jnp.float32)
        wk = s * jax.random.normal(ks[3], (C8, Ca), dtype=jnp.float32)
        bk = s * jax.random.normal(ks[4], (C8,), dtype=jnp.float32)
        wv = s * jax.random.normal(ks[5], (Ca, Ca), dtype=jnp.float32)
        bv = s * jax.random.normal(ks[6], (Ca,), dtype=jnp.float32)
        gamma = jnp.array([0.5], dtype=jnp.float32)  # 0.5 to exercise attention path

        out = jax.block_until_ready(
            self_attention(xa_in, wq, bq, wk, bk, wv, bv, gamma))
        ref = self_attention_ref(xa_in, wq, bq, wk, bk, wv, bv, gamma)
        assert out.shape == xa_in.shape
        # bf16 MXU operands (f32 acc) + approx reciprocal => loosened tolerance.
        assert jnp.allclose(out, ref, atol=2e-2, rtol=2e-2), (
            idx, float(jnp.max(jnp.abs(out - ref))))

    print("KERNEL_OK")
</pallas_src>

<mosaic_0001>
module attributes {stable_mosaic.version = 11 : i64} {
  func.func @_conv_mm_kernel(%arg0: i32, %arg1: memref<128x288xbf16, #tpu.memory_space<vmem>>, %arg2: memref<288x128xbf16, #tpu.memory_space<vmem>>, %arg3: memref<1x128xf32, #tpu.memory_space<vmem>>, %arg4: memref<128x128xf32, #tpu.memory_space<vmem>>) attributes {dimension_semantics = [#tpu.dimension_semantics<parallel>], iteration_bounds = array<i64: 1>, scalar_prefetch = 0 : i64, scratch_operands = 0 : i64, tpu.core_type = #tpu.core_type<tc>, window_params = [{transform_indices = @transform_0, window_bounds = array<i64: 128, 288>}, {pipeline_mode = #tpu.pipeline_mode<synchronous>, transform_indices = @transform_1, window_bounds = array<i64: 288, 128>}, {pipeline_mode = #tpu.pipeline_mode<synchronous>, transform_indices = @transform_2, window_bounds = array<i64: 1, 128>}, {transform_indices = @transform_3, window_bounds = array<i64: 128, 128>}]} {
    %c0 = arith.constant 0 : index
    %c0_0 = arith.constant 0 : index
    %0 = vector.load %arg1[%c0, %c0_0] : memref<128x288xbf16, #tpu.memory_space<vmem>>, vector<128x288xbf16>
    %c0_1 = arith.constant 0 : index
    %c0_2 = arith.constant 0 : index
    %1 = vector.load %arg2[%c0_1, %c0_2] : memref<288x128xbf16, #tpu.memory_space<vmem>>, vector<288x128xbf16>
    %cst = arith.constant dense<0.000000e+00> : vector<128x128xf32>
    %2 = tpu.matmul %0, %1, %cst {dimension_numbers = #tpu.dot_dimension_numbers<[1], [0], [0], [1], [0, 0, 1, 1], [], []>} : vector<128x288xbf16>, vector<288x128xbf16>, vector<128x128xf32> -> vector<128x128xf32>
    %c0_3 = arith.constant 0 : index
    %c0_4 = arith.constant 0 : index
    %3 = vector.load %arg3[%c0_3, %c0_4] : memref<1x128xf32, #tpu.memory_space<vmem>>, vector<1x128xf32>
    %4 = vector.broadcast %3 : vector<1x128xf32> to vector<128x128xf32>
    %5 = arith.addf %2, %4 : vector<128x128xf32>
    %cst_5 = arith.constant 0.000000e+00 : f32
    %6 = vector.broadcast %cst_5 : f32 to vector<128x128xf32>
    %7 = arith.cmpf ogt, %5, %6 : vector<128x128xf32>
    %cst_6 = arith.constant 2.000000e-01 : f32
    %8 = vector.broadcast %cst_6 : f32 to vector<128x128xf32>
    %9 = arith.mulf %8, %5 : vector<128x128xf32>
    %10 = arith.select %7, %5, %9 : vector<128x128xi1>, vector<128x128xf32>
    %c0_7 = arith.constant 0 : index
    %c0_8 = arith.constant 0 : index
    %11 = vector.load %arg4[%c0_7, %c0_8] : memref<128x128xf32, #tpu.memory_space<vmem>>, vector<128x128xf32>
    tpu.vector_store %arg4[%c0_7, %c0_8], %10 {strides = array<i32>} : memref<128x128xf32, #tpu.memory_space<vmem>>, vector<128x128xf32>,
    return
  }
  func.func @transform_0(%arg0: i32) -> (i32, i32) {
    %c0_i32 = arith.constant 0 : i32
    %c0_i32_0 = arith.constant 0 : i32
    return %arg0, %c0_i32 : i32, i32
  }
  func.func @transform_1(%arg0: i32) -> (i32, i32) {
    %c0_i32 = arith.constant 0 : i32
    %c0_i32_0 = arith.constant 0 : i32
    %c0_i32_1 = arith.constant 0 : i32
    return %c0_i32, %c0_i32_0 : i32, i32
  }
  func.func @transform_2(%arg0: i32) -> (i32, i32) {
    %c0_i32 = arith.constant 0 : i32
    %c0_i32_0 = arith.constant 0 : i32
    %c0_i32_1 = arith.constant 0 : i32
    return %c0_i32, %c0_i32_0 : i32, i32
  }
  func.func @transform_3(%arg0: i32) -> (i32, i32) {
    %c0_i32 = arith.constant 0 : i32
    %c0_i32_0 = arith.constant 0 : i32
    return %arg0, %c0_i32 : i32, i32
  }
}

</mosaic_0001>

<bundles_post_ra>
// kernel: tpu_custom_call.1
= control target key start
LH: loop header
LB: loop body
LE: loop exit
PB: predicated region body
PF: predicated region fallthrough
CT: control target
= control target key end

     0   :  { %s1058_s0 = inlined_call_operand.vmem [shape: bf16[128,288], index: 0, kind: input, shape index: {}]   ;;  %s1059_s1 = inlined_call_operand.vmem [shape: bf16[288,128], index: 1, kind: input, shape index: {}]   ;;  %s1060_s2 = inlined_call_operand.vmem [shape: f32[1,128], index: 2, kind: input, shape index: {}]   ;;  %s1061_s3 = inlined_call_operand.hbm [shape: f32[128,128], index: 3, kind: output, shape index: {}]  }
   0x1   :  { %v782_v0 = vld [vmem:[%s1059_s1 + $0x40] sm:$0xff]   ;;  %v784_v2 = vld [vmem:[%s1059_s1 + $0x48] sm:$0xff]   ;;  %v786_v4 = vld [vmem:[%s1059_s1 + $0x50] sm:$0xff]  }
   0x2   :  { %v783_v1 = vld [vmem:[%s1059_s1] sm:$0xff]   ;;  %669 = vmatprep.subr.bf16.mxu0 %v782_v0  ;;  %763 = vmatprep.subr.bf16.mxu1 %v782_v0  ;;  %v785_v3 = vld [vmem:[%s1059_s1 + $0x8] sm:$0xff]   ;;  %v787_v5 = vld [vmem:[%s1059_s1 + $0x10] sm:$0xff]  }
   0x3   :  { %670 = vmatpush3.bf16.msra.mxu0 %v783_v1  ;;  %771 = vmatpush3.bf16.msra.mxu1 %v783_v1  ;;  %v788_v6 = vld [vmem:[%s1059_s1 + $0x58] sm:$0xff]   ;;  %v790_v8 = vld [vmem:[%s1059_s1 + $0x60] sm:$0xff]   ;;  %v792_v10 = vld [vmem:[%s1059_s1 + $0x68] sm:$0xff]  }
   0x4   :  { %671 = vmatprep.subr.bf16.mxu0 %v784_v2  ;;  %764 = vmatprep.subr.bf16.mxu1 %v784_v2  ;;  %v789_v7 = vld [vmem:[%s1059_s1 + $0x18] sm:$0xff]   ;;  %v791_v9 = vld [vmem:[%s1059_s1 + $0x20] sm:$0xff]   ;;  %v793_v13 = vld [vmem:[%s1059_s1 + $0x28] sm:$0xff]  }
   0x5   :  { %v800_v11 = vld [vmem:[%s1058_s0 + $0x4] ss:$12 sps:$4 sm:$0xff]   ;;  %v803_v12 = vld [vmem:[%s1058_s0 + $0x94] ss:$12 sps:$4 sm:$0xff]   ;;  %v796_v16 = vld [vmem:[%s1059_s1 + $0x78] sm:$0xff]  }
   0x6   :  { %v794_v14 = vld [vmem:[%s1059_s1 + $0x70] sm:$0xff]   ;;  %376 = vmatprep.mubr.bf16.mxu0 %v800_v11  ;;  %424 = vmatprep.mubr.bf16.mxu1 %v803_v12  ;;  %v797_v17 = vld [vmem:[%s1059_s1 + $0x38] sm:$0xff]   ;;  %v798_v18 = vld [vmem:[%s1058_s0] ss:$12 sps:$4 sm:$0xff]  }
   0x7   :  { %672 = vmatpush3.bf16.msra.mxu0 %v785_v3  ;;  %772 = vmatpush3.bf16.msra.mxu1 %v785_v3  ;;  %v795_v15 = vld [vmem:[%s1059_s1 + $0x30] sm:$0xff]   ;;  %v804_v19 = vld [vmem:[%s1059_s1 + $0x80] sm:$0xff]   ;;  %v805_v21 = vld [vmem:[%s1058_s0 + $0x1c] ss:$12 sps:$4 sm:$0xff]  }
   0x8   :  { %673 = vmatprep.subr.bf16.mxu0 %v786_v4  ;;  %765 = vmatprep.subr.bf16.mxu1 %v786_v4  ;;  %v801_v20 = vld [vmem:[%s1058_s0 + $0x90] ss:$12 sps:$4 sm:$0xff]   ;;  %v807_v22 = vld [vmem:[%s1058_s0 + $0xac] ss:$12 sps:$4 sm:$0xff]  }
   0x9   :  { %v811_v23 = vld [vmem:[%s1059_s1 + $0x88] sm:$0xff]  }
   0xb   :  { %674 = vmatpush3.bf16.msra.mxu0 %v787_v5  ;;  %773 = vmatpush3.bf16.msra.mxu1 %v787_v5 }
   0xc   :  { %675 = vmatprep.subr.bf16.mxu0 %v788_v6  ;;  %766 = vmatprep.subr.bf16.mxu1 %v788_v6 }
   0xf   :  { %676 = vmatpush3.bf16.msra.mxu0 %v789_v7  ;;  %774 = vmatpush3.bf16.msra.mxu1 %v789_v7 }
  0x10   :  { %677 = vmatprep.subr.bf16.mxu0 %v790_v8  ;;  %767 = vmatprep.subr.bf16.mxu1 %v790_v8 }
  0x13   :  { %678 = vmatpush3.bf16.msra.mxu0 %v791_v9  ;;  %775 = vmatpush3.bf16.msra.mxu1 %v791_v9 }
  0x14   :  { %679 = vmatprep.subr.bf16.mxu0 %v792_v10  ;;  %768 = vmatprep.subr.bf16.mxu1 %v792_v10 }
  0x17   :  { %680 = vmatpush3.bf16.msra.mxu0 %v793_v13  ;;  %776 = vmatpush3.bf16.msra.mxu1 %v793_v13 }
  0x18   :  { %681 = vmatprep.subr.bf16.mxu0 %v794_v14  ;;  %769 = vmatprep.subr.bf16.mxu1 %v794_v14 }
  0x1b   :  { %682 = vmatpush3.bf16.msra.mxu0 %v795_v15  ;;  %777 = vmatpush3.bf16.msra.mxu1 %v795_v15 }
  0x1c   :  { %683 = vmatprep.subr.bf16.mxu0 %v796_v16  ;;  %770 = vmatprep.subr.bf16.mxu1 %v796_v16 }
  0x1f   :  { %684 = vmatpush3.bf16.msra.mxu0 %v797_v17  ;;  %778 = vmatpush3.bf16.msra.mxu1 %v797_v17 }
  0x20   :  { %743 = vmatprep.subr.bf16.mxu1 %v804_v19 }
  0x22   :  { %377 = vmatmul.mubr.bf16.vlgmr.msra.gmra.mrb[0].mxu0 %v798_v18  ;;  %425 = vmatmul.mubr.bf16.vlgmr.msra.gmra.mrb[0].mxu1 %v801_v20 }
  0x23   :  { %744 = vmatpush3.bf16.msra.mxu1 %v804_v19  ;;  %384 = vmatprep.mubr.bf16.mxu0 %v805_v21 }
  0x24   :  { %432 = vmatprep.mubr.bf16.mxu1 %v807_v22  ;;  %745 = vmatprep.subr.bf16.mxu1 %v811_v23 }
  0x25   :  { %8 = vsyncpa [#allocation3], 0  ;;  %v809_v24 = vld [vmem:[%s1058_s0 + $0x18] ss:$12 sps:$4 sm:$0xff]   ;;  %v810_v25 = vld [vmem:[%s1058_s0 + $0xa8] ss:$12 sps:$4 sm:$0xff]  }
  0x26   :  { %v812_v26 = vld [vmem:[%s1058_s0 + $0x34] ss:$12 sps:$4 sm:$0xff]   ;;  %vm319_vm0 = vcmask 261120   ;;  %v815_v28 = vld [vmem:[%s1058_s0 + $0x30] ss:$12 sps:$4 sm:$0xff]  }
  0x27   :  { %746 = vmatpush3.bf16.msra.mxu1 %v811_v23  ;;  %v814_v27 = vld [vmem:[%s1058_s0 + $0x8] ss:$12 sps:$4 sm:$0xff]   ;;  %v816_v29 = vld [vmem:[%s1058_s0 + $0x20] ss:$12 sps:$4 sm:$0xff]   ;;  %v819_v31 = vld [vmem:[%s1058_s0 + $0x38] ss:$12 sps:$4 sm:$0xff]  }
  0x28   :  { %v817_v30 = vld [vmem:[%s1058_s0 + $0x4c] ss:$12 sps:$4 sm:$0xff]   ;;  %v820_v32 = vld [vmem:[%s1058_s0 + $0x48] ss:$12 sps:$4 sm:$0xff]   ;;  %v821_v33 = vld [vmem:[%s1058_s0 + $0x50] ss:$12 sps:$4 sm:$0xff]  }
  0x29   :  { %v822_v34 = vld [vmem:[%s1058_s0 + $0x64] ss:$12 sps:$4 sm:$0xff]   ;;  %v824_v35 = vld [vmem:[%s1058_s0 + $0x68] ss:$12 sps:$4 sm:$0xff]   ;;  %v825_v36 = vld [vmem:[%s1058_s0 + $0x60] ss:$12 sps:$4 sm:$0xff]  }
  0x2a   :  { %385 = vmatmul.mubr.bf16.gmra.mrb[4].mxu0 %v809_v24  ;;  %433 = vmatmul.mubr.bf16.gmra.mrb[4].mxu1 %v810_v25  ;;  %v826_v37 = vld [vmem:[%s1058_s0 + $0x80] ss:$12 sps:$4 sm:$0xff]   ;;  %v827_v38 = vld [vmem:[%s1058_s0 + $0x7c] ss:$12 sps:$4 sm:$0xff]   ;;  %v829_v39 = vld [vmem:[%s1058_s0 + $0x98] ss:$12 sps:$4 sm:$0xff]  }
  0x2b   :  { %392 = vmatprep.mubr.bf16.mxu0 %v812_v26  ;;  %747 = vmatprep.mubr.msk.bf16.mxu1 %vm319_vm0, %v814_v27  ;;  %v830_v40 = vld [vmem:[%s1058_s0 + $0x78] ss:$12 sps:$4 sm:$0xff]   ;;  %v831_v41 = vld [vmem:[%s1058_s0 + $0xb0] ss:$12 sps:$4 sm:$0xff]   ;;  %v1024_v2 = vld [vmem:[%s1060_s2] ss:$0 sm:$0xff] }
  0x2c   :  { %s856_s2 = smov [#allocation2]  }
  0x2d   :  { %s607_s14 = sshll.u32 %s856_s2, 4  ;;  %s608_s14 = int_to_ptr.vmem [resolvable:$true] %s607_s14 }
  0x2e   :  { %s832_s15 = scalar_lea.vmem %s608_s14, 2048  ;;  %p837_p1 = scmp.lt.s32.totalorder %s608_s14, %s608_s14 }
  0x2f   :  { %p833_p0 = scmp.ne.s32.totalorder %s608_s14, %s832_s15  ;;  %p838_p2 = scmp.lt.s32.totalorder %s832_s15, %s832_s15 }
  0x31   :  { %p839_p3 = por %p838_p2, %p837_p1 }
  0x32   :  { %393 = vmatmul.mubr.bf16.gmra.mrb[8].mxu0 %v815_v28  ;;  %748 = vmatmul.mubr.msk.bf16.vlgmr.msra.gmra.mrb[8].mxu1 %vm319_vm0, %v816_v29 }
  0x33   :  { %400 = vmatprep.mubr.bf16.mxu0 %v817_v30  ;;  %751 = vmatprep.mubr.msk.bf16.mxu1 %vm319_vm0, %v819_v31  ;;  %p840_p4 = pnand %p839_p3, %p833_p0 }
  0x3a   :  { %401 = vmatmul.mubr.bf16.gmra.mrb[12].mxu0 %v820_v32  ;;  %752 = vmatmul.mubr.msk.bf16.gmra.mrb[12].mxu1 %vm319_vm0, %v821_v33 }
  0x3b   :  { %408 = vmatprep.mubr.bf16.mxu0 %v822_v34  ;;  %755 = vmatprep.mubr.msk.bf16.mxu1 %vm319_vm0, %v824_v35 }
  0x42   :  { %409 = vmatmul.mubr.bf16.gmra.mrb[16].mxu0 %v825_v36  ;;  %756 = vmatmul.mubr.msk.bf16.gmra.mrb[16].mxu1 %vm319_vm0, %v826_v37 }
  0x43   :  { %416 = vmatprep.mubr.bf16.mxu0 %v827_v38  ;;  %759 = vmatprep.mubr.msk.bf16.mxu1 %vm319_vm0, %v829_v39 }
  0x4a   :  { %417 = vmatmul.mubr.bf16.gmra.mrb[20].mxu0 %v830_v40  ;;  %760 = vmatmul.mubr.msk.bf16.gmra.mrb[20].mxu1 %vm319_vm0, %v831_v41 }
  0xf5   :  { %v685_v42 = vpop.f32.mrb[0].mxu0  ;;  %v721_v43 = vpop.f32.mrb[0].mxu1 }
  0xf6   :  { %v686_v44 = vpop.f32.mrb[1].mxu0  ;;  %v722_v45 = vpop.f32.mrb[1].mxu1 }
  0xf7   :  { %v687_v46 = vadd.f32 %v686_v44, %v685_v42  ;;  %v688_v47 = vpop.f32.mrb[2].mxu0  ;;  %v1013_v48 = vadd.f32 %v722_v45, %v721_v43  ;;  %v724_v49 = vpop.f32.mrb[2].mxu1 }
  0xf8   :  { %v689_v50 = vpop.f32.mrb[3].mxu0  ;;  %v725_v51 = vpop.f32.mrb[3].mxu1 }
  0xf9   :  { %v690_v52 = vadd.f32 %v689_v50, %v688_v47  ;;  %v1015_v53 = vadd.f32 %v725_v51, %v724_v49  ;;  %v379_v6 = vadd.f32 %v687_v46, %v1024_v2 }
  0xfb   :  { %v382_v15 = vadd.f32 %v690_v52, %v1024_v2 }
  0xfd   :  { %v691_v54 = vpop.f32.mrb[4].mxu0  ;;  %v727_v55 = vpop.f32.mrb[4].mxu1 }
  0xfe   :  { %v692_v56 = vpop.f32.mrb[5].mxu0  ;;  %v728_v57 = vpop.f32.mrb[5].mxu1 }
  0xff   :  { %v693_v58 = vadd.f32 %v692_v56, %v691_v54  ;;  %v694_v59 = vpop.f32.mrb[6].mxu0  ;;  %v1017_v60 = vadd.f32 %v728_v57, %v727_v55  ;;  %v730_v61 = vpop.f32.mrb[6].mxu1 }
 0x100   :  { %v695_v62 = vpop.f32.mrb[7].mxu0  ;;  %v731_v63 = vpop.f32.mrb[7].mxu1 }
 0x101   :  { %v696_v0 = vadd.f32 %v695_v62, %v694_v59  ;;  %v1019_v1 = vadd.f32 %v731_v63, %v730_v61  ;;  %v387_v3 = vadd.f32 %v693_v58, %v1024_v2 }
 0x103   :  { %v390_v10 = vadd.f32 %v696_v0, %v1024_v2 }
 0x105   :  { %v697_v4 = vpop.f32.mrb[8].mxu0  ;;  %v749_v5 = vpop.f32.mrb[8].mxu1 }
 0x106   :  { %v484_v7 = vadd.f32 %v749_v5, %v387_v3  ;;  %v698_v8 = vpop.f32.mrb[9].mxu0  ;;  %v475_v9 = vpop.f32.mrb[9].mxu1 }
 0x107   :  { %v699_v11 = vadd.f32 %v698_v8, %v697_v4  ;;  %v476_v12 = vadd.f32 %v475_v9, %v379_v6  ;;  %v700_v13 = vpop.f32.mrb[10].mxu0  ;;  %v750_v14 = vpop.f32.mrb[10].mxu1  ;;  %v435_v9 = vadd.f32 %v1017_v60, %v1024_v2 }
 0x108   :  { %vm540_vm1 = vcmp.gt.f32.partialorder %v484_v7, 0.0  ;;  %v556_v16 = vmul.f32 0.2, %v484_v7  ;;  %v487_v17 = vadd.f32 %v750_v14, %v390_v10  ;;  %v701_v18 = vpop.f32.mrb[11].mxu0  ;;  %v478_v19 = vpop.f32.mrb[11].mxu1 }
 0x109   :  { %vm538_vm2 = vcmp.gt.f32.partialorder %v476_v12, 0.0  ;;  %v554_v20 = vmul.f32 0.2, %v476_v12  ;;  %v702_v21 = vadd.f32 %v701_v18, %v700_v13  ;;  %v479_v22 = vadd.f32 %v478_v19, %v382_v15 }
 0x10a   :  { %v572_v23 = vsel %vm540_vm1, %v484_v7, %v556_v16  ;;  %vm541_vm3 = vcmp.gt.f32.partialorder %v487_v17, 0.0  ;;  %v557_v24 = vmul.f32 0.2, %v487_v17  ;;  %v395_v31 = vadd.f32 %v699_v11, %v1024_v2 }
 0x10b   :  { %588 = vst [vmem:[#allocation2 + $0x10] sm:$0xff] %v572_v23  ;;  %v570_v25 = vsel %vm538_vm2, %v476_v12, %v554_v20  ;;  %vm539_vm4 = vcmp.gt.f32.partialorder %v479_v22, 0.0  ;;  %v555_v26 = vmul.f32 0.2, %v479_v22  ;;  %v398_v39 = vadd.f32 %v702_v21, %v1024_v2 }
 0x10c   :  { %586 = vst [vmem:[#allocation2] sm:$0xff] %v570_v25  ;;  %v573_v27 = vsel %vm541_vm3, %v487_v17, %v557_v24  ;;  %v427_v16 = vadd.f32 %v1013_v48, %v1024_v2  ;;  %v438_v18 = vadd.f32 %v1019_v1, %v1024_v2  ;;  %v430_v19 = vadd.f32 %v1015_v53, %v1024_v2 }
 0x10d   :  { %589 = vst [vmem:[#allocation2 + $0x18] sm:$0xff] %v573_v27  ;;  %v571_v28 = vsel %vm539_vm4, %v479_v22, %v555_v26  ;;  %v703_v29 = vpop.f32.mrb[12].mxu0  ;;  %v753_v30 = vpop.f32.mrb[12].mxu1 }
 0x10e   :  { %587 = vst [vmem:[#allocation2 + $0x8] sm:$0xff] %v571_v28  ;;  %v704_v32 = vpop.f32.mrb[13].mxu0  ;;  %v491_v33 = vpop.f32.mrb[13].mxu1 }
 0x10f   :  { %v705_v34 = vadd.f32 %v704_v32, %v703_v29  ;;  %v492_v35 = vadd.f32 %v491_v33, %v395_v31  ;;  %v706_v36 = vpop.f32.mrb[14].mxu0  ;;  %v754_v37 = vpop.f32.mrb[14].mxu1 }
 0x110   :  { %v707_v38 = vpop.f32.mrb[15].mxu0  ;;  %v494_v40 = vpop.f32.mrb[15].mxu1 }
 0x111   :  { %v403_v41 = vadd.f32 %v705_v34, %v1024_v2  ;;  %vm542_vm5 = vcmp.gt.f32.partialorder %v492_v35, 0.0  ;;  %v558_v42 = vmul.f32 0.2, %v492_v35  ;;  %v708_v43 = vadd.f32 %v707_v38, %v706_v36 }
 0x112   :  { %v495_v44 = vadd.f32 %v494_v40, %v398_v39 }
 0x113   :  { %v500_v45 = vadd.f32 %v753_v30, %v403_v41  ;;  %v574_v46 = vsel %vm542_vm5, %v492_v35, %v558_v42  ;;  %v406_v47 = vadd.f32 %v708_v43, %v1024_v2 }
 0x114   :  { %590 = vst [vmem:[#allocation2 + $0x20] sm:$0xff] %v574_v46  ;;  %vm543_vm6 = vcmp.gt.f32.partialorder %v495_v44, 0.0  ;;  %v559_v49 = vmul.f32 0.2, %v495_v44 }
 0x115   :  { %vm544_vm7 = vcmp.gt.f32.partialorder %v500_v45, 0.0  ;;  %v560_v50 = vmul.f32 0.2, %v500_v45  ;;  %v503_v51 = vadd.f32 %v754_v37, %v406_v47  ;;  %v709_v52 = vpop.f32.mrb[16].mxu0  ;;  %v757_v54 = vpop.f32.mrb[16].mxu1 }
 0x116   :  { %v575_v55 = vsel %vm543_vm6, %v495_v44, %v559_v49  ;;  %v710_v56 = vpop.f32.mrb[17].mxu0  ;;  %v507_v57 = vpop.f32.mrb[17].mxu1 }
 0x117   :  { %v576_v58 = vsel %vm544_vm7, %v500_v45, %v560_v50  ;;  %vm545_vm8 = vcmp.gt.f32.partialorder %v503_v51, 0.0  ;;  %v561_v59 = vmul.f32 0.2, %v503_v51  ;;  %591 = vst [vmem:[#allocation2 + $0x28] sm:$0xff] %v575_v55  ;;  %v711_v61 = vadd.f32 %v710_v56, %v709_v52  ;;  %v712_v62 = vpop.f32.mrb[18].mxu0  ;;  %v758_v63 = vpop.f32.mrb[18].mxu1 }
 0x118   :  { %592 = vst [vmem:[#allocation2 + $0x30] sm:$0xff] %v576_v58  ;;  %v713_v0 = vpop.f32.mrb[19].mxu0  ;;  %v510_v3 = vpop.f32.mrb[19].mxu1 }
 0x119   :  { %v577_v4 = vsel %vm545_vm8, %v503_v51, %v561_v59  ;;  %v411_v5 = vadd.f32 %v711_v61, %v1024_v2  ;;  %v714_v6 = vadd.f32 %v713_v0, %v712_v62 }
 0x11a   :  { %593 = vst [vmem:[#allocation2 + $0x38] sm:$0xff] %v577_v4 }
 0x11b   :  { %v508_v7 = vadd.f32 %v507_v57, %v411_v5  ;;  %v414_v8 = vadd.f32 %v714_v6, %v1024_v2 }
 0x11d   :  { %vm546_vm9 = vcmp.gt.f32.partialorder %v508_v7, 0.0  ;;  %v562_v10 = vmul.f32 0.2, %v508_v7  ;;  %v511_v11 = vadd.f32 %v510_v3, %v414_v8  ;;  %v715_v12 = vpop.f32.mrb[20].mxu0  ;;  %v761_v13 = vpop.f32.mrb[20].mxu1 }
 0x11e   :  { %v532_v14 = vadd.f32 %v761_v13, %v435_v9  ;;  %v716_v15 = vpop.f32.mrb[21].mxu0  ;;  %v523_v17 = vpop.f32.mrb[21].mxu1 }
 0x11f   :  { %v578_v20 = vsel %vm546_vm9, %v508_v7, %v562_v10  ;;  %vm547_vm10 = vcmp.gt.f32.partialorder %v511_v11, 0.0  ;;  %v563_v60 = vmul.f32 0.2, %v511_v11  ;;  %v717_v21 = vadd.f32 %v716_v15, %v715_v12  ;;  %v718_v22 = vpop.f32.mrb[22].mxu0  ;;  %v762_v23 = vpop.f32.mrb[22].mxu1 }
 0x120   :  { %594 = vst [vmem:[#allocation2 + $0x40] sm:$0xff] %v578_v20  ;;  %vm552_vm11 = vcmp.gt.f32.partialorder %v532_v14, 0.0  ;;  %v568_v24 = vmul.f32 0.2, %v532_v14  ;;  %v524_v25 = vadd.f32 %v523_v17, %v427_v16  ;;  %v535_v26 = vadd.f32 %v762_v23, %v438_v18  ;;  %v719_v27 = vpop.f32.mrb[23].mxu0  ;;  %v526_v48 = vpop.f32.mrb[23].mxu1 }
 0x121   :  { %v579_v28 = vsel %vm547_vm10, %v511_v11, %v563_v60  ;;  %v419_v29 = vadd.f32 %v717_v21, %v1024_v2  ;;  %v720_v1 = vadd.f32 %v719_v27, %v718_v22  ;;  %v527_v30 = vadd.f32 %v526_v48, %v430_v19 }
 0x122   :  { %595 = vst [vmem:[#allocation2 + $0x48] sm:$0xff] %v579_v28  ;;  %v584_v53 = vsel %vm552_vm11, %v532_v14, %v568_v24  ;;  %vm550_vm12 = vcmp.gt.f32.partialorder %v524_v25, 0.0  ;;  %v566_v31 = vmul.f32 0.2, %v524_v25  ;;  %vm553_vm13 = vcmp.gt.f32.partialorder %v535_v26, 0.0 }
 0x123   :  { %600 = vst [vmem:[#allocation2 + $0x70] sm:$0xff] %v584_v53  ;;  %v516_v32 = vadd.f32 %v757_v54, %v419_v29  ;;  %v569_v33 = vmul.f32 0.2, %v535_v26  ;;  %v422_v34 = vadd.f32 %v720_v1, %v1024_v2  ;;  %vm551_vm14 = vcmp.gt.f32.partialorder %v527_v30, 0.0 }
 0x124   :  { %v582_v35 = vsel %vm550_vm12, %v524_v25, %v566_v31  ;;  %v567_v36 = vmul.f32 0.2, %v527_v30 }
 0x125   :  { %vm548_vm15 = vcmp.gt.f32.partialorder %v516_v32, 0.0  ;;  %v564_v37 = vmul.f32 0.2, %v516_v32  ;;  %598 = vst [vmem:[#allocation2 + $0x60] sm:$0xff] %v582_v35  ;;  %v585_v38 = vsel %vm553_vm13, %v535_v26, %v569_v33  ;;  %v519_v39 = vadd.f32 %v758_v63, %v422_v34 }
 0x126   :  { %601 = vst [vmem:[#allocation2 + $0x78] sm:$0xff] %v585_v38  ;;  %v583_v40 = vsel %vm551_vm14, %v527_v30, %v567_v36 }
 0x127   :  { %v580_v41 = vsel %vm548_vm15, %v516_v32, %v564_v37  ;;  %vm549_vm0 = vcmp.gt.f32.partialorder %v519_v39, 0.0  ;;  %v565_v42 = vmul.f32 0.2, %v519_v39  ;;  %599 = vst [vmem:[#allocation2 + $0x68] sm:$0xff] %v583_v40 }
 0x128   :  { %596 = vst [vmem:[#allocation2 + $0x50] sm:$0xff] %v580_v41 }
 0x129   :  { %v581_v43 = vsel %vm549_vm0, %v519_v39, %v565_v42 }
 0x12a   :  { %597 = vst [vmem:[#allocation2 + $0x58] sm:$0xff] %v581_v43 }
 0x12b   :  { %843 = shalt.err (!%p840_p4)
}
 0x12c   :  { %s844_s18 = scalar_lea.hbm %s1061_s3, 2048 }
 0x12d   :  { %p845_p5 = scmp.ne.s32.totalorder %s1061_s3, %s844_s18  ;;  %p848_p6 = scmp.lt.u32.totalorder %s844_s18, %s1061_s3 }
 0x12f   :  { %p850_p7 = pnand %p848_p6, %p845_p5 }
 0x131   :  { %853 = shalt.err (!%p850_p7)
}
 0x132   :  { %s857_s23 = smov 128   ;;  %s858_s24 = smov 8  }
 0x133   :  { %613 = dma.vmem_to_hbm [thread:$0]  %s608_s14, 2048, %s1061_s3, [#allocation3], %s857_s23, %s857_s23, %s858_s24  }
 0x134   :  { %854 = dma.done.wait [#allocation3], 2048  }
 0x135   :  { %855 = vsyncadd [#allocation3], 4294965248 }
 0x136   :  { %617 = vsyncpa [#allocation3], 1 }

</bundles_post_ra>
